<compile_context>
chip_gen: v7x
topology: tpu7x:2x2x1
jax: 0.10.0
libtpu: 0.0.40
codegen_flags: <defaults>
</compile_context>

<pallas_src>
import jax
import jax.numpy as jnp
from jax.experimental import pallas as pl
from jax.experimental.pallas import tpu as pltpu


# ----------------------------------------------------------------------------
# Pallas kernels
# ----------------------------------------------------------------------------
def _fc1_relu_stats_kernel(x_ref, w_ref, b_ref, mask_ref, h_ref, ssum_ref, ssq_ref):
    # x_ref: (TB, H) f32   w_ref: (H, H) bf16 (in, out)   b_ref: (1, H) f32
    # mask_ref: (TB, 1) f32 (1.0 valid row / 0.0 padded row)
    # h_ref: (TB, H) bf16  ssum_ref/ssq_ref: (1, 1, H) f32 per-tile partial stats
    acc = jnp.dot(x_ref[...].astype(jnp.bfloat16), w_ref[...],
                  preferred_element_type=jnp.float32)
    h = jnp.maximum(acc + b_ref[...], 0.0)
    h_ref[...] = h.astype(h_ref.dtype)
    hm = h * mask_ref[...]                      # padded rows contribute 0 to stats
    ssum_ref[0] = jnp.sum(hm, axis=0, keepdims=True)
    ssq_ref[0] = jnp.sum(hm * hm, axis=0, keepdims=True)


def _bn1_fc2_res_relu_stats_kernel(h_ref, x_ref, w_ref, b_ref, s1_ref, t1_ref,
                                   mask_ref, r_ref, rsum_ref, rsq_ref):
    # Applies bn1 (scale/shift precomputed on host) as a prologue, then
    # fc2 + bias + residual + ReLU, and emits partial stats for bn2.
    hn = h_ref[...].astype(jnp.float32) * s1_ref[...] + t1_ref[...]
    z = jnp.dot(hn.astype(jnp.bfloat16), w_ref[...],
                preferred_element_type=jnp.float32)
    r = jnp.maximum(z + b_ref[...] + x_ref[...], 0.0)
    r_ref[...] = r
    rm = r * mask_ref[...]
    rsum_ref[0] = jnp.sum(rm, axis=0, keepdims=True)
    rsq_ref[0] = jnp.sum(rm * rm, axis=0, keepdims=True)


def _affine_kernel(r_ref, s_ref, t_ref, o_ref):
    # Final bn2 application (no downstream consumer to fuse into).
    # Output buffer is aliased onto r (input_output_aliases) -> in-place.
    o_ref[...] = r_ref[...] * s_ref[...] + t_ref[...]


# ----------------------------------------------------------------------------
# Host-side glue
# ----------------------------------------------------------------------------
def _round_up(a, b):
    return (a + b - 1) // b * b


def _bn_scale_shift(ssum, ssq, n_valid, gamma, beta, eps):
    """Reduce per-tile partial stats -> per-channel scale/shift (training-mode BN)."""
    mean = jnp.sum(ssum, axis=(0, 1)) / n_valid
    var = jnp.maximum(jnp.sum(ssq, axis=(0, 1)) / n_valid - mean * mean, 0.0)
    scale = gamma / jnp.sqrt(var + eps)
    shift = beta - mean * scale
    return scale.reshape(1, -1), shift.reshape(1, -1)


@jax.jit
def resblock_fc_forward(x, params):
    eps = 1e-5
    n_h = params["b1"].shape[0]
    x2 = x.reshape(-1, n_h).astype(jnp.float32)          # x.view(-1, n_h)
    B = x2.shape[0]

    # Row tiling: sublane aligned, capped so double-buffered blocks stay small
    # even for large hidden sizes (fits v7x's smaller scoped VMEM).
    TB = min(_round_up(max(B, 1), 8), 256)
    Bp = _round_up(B, TB)
    nt = Bp // TB
    x2p = x2 if Bp == B else jnp.pad(x2, ((0, Bp - B), (0, 0)))
    mask = (jnp.arange(Bp, dtype=jnp.int32) < B).astype(jnp.float32).reshape(Bp, 1)

    w1, w2 = params["w1"], params["w2"]                   # (H, H) bf16, (in, out)
    b1 = params["b1"].reshape(1, n_h)
    b2 = params["b2"].reshape(1, n_h)

    row_spec = pl.BlockSpec((TB, n_h), lambda i: (i, 0))
    vec_spec = pl.BlockSpec((1, n_h), lambda i: (0, 0))
    mat_spec = pl.BlockSpec((n_h, n_h), lambda i: (0, 0))
    mask_spec = pl.BlockSpec((TB, 1), lambda i: (i, 0))
    stat_spec = pl.BlockSpec((1, 1, n_h), lambda i: (i, 0, 0))
    cparams = pltpu.CompilerParams(dimension_semantics=("parallel",))

    # Stage 1: h = relu(x @ W1 + b1)  + partial stats for bn1.
    h, s1, q1 = pl.pallas_call(
        _fc1_relu_stats_kernel,
        out_shape=(jax.ShapeDtypeStruct((Bp, n_h), jnp.bfloat16),
                   jax.ShapeDtypeStruct((nt, 1, n_h), jnp.float32),
                   jax.ShapeDtypeStruct((nt, 1, n_h), jnp.float32)),
        grid=(nt,),
        in_specs=[row_spec, mat_spec, vec_spec, mask_spec],
        out_specs=(row_spec, stat_spec, stat_spec),
        compiler_params=cparams,
    )(x2p, w1, b1, mask)

    scale1, shift1 = _bn_scale_shift(s1, q1, B, params["g1"], params["be1"], eps)

    # Stage 2: r = relu((bn1(h)) @ W2 + b2 + x)  + partial stats for bn2.
    r, s2, q2 = pl.pallas_call(
        _bn1_fc2_res_relu_stats_kernel,
        out_shape=(jax.ShapeDtypeStruct((Bp, n_h), jnp.float32),
                   jax.ShapeDtypeStruct((nt, 1, n_h), jnp.float32),
                   jax.ShapeDtypeStruct((nt, 1, n_h), jnp.float32)),
        grid=(nt,),
        in_specs=[row_spec, row_spec, mat_spec, vec_spec, vec_spec, vec_spec, mask_spec],
        out_specs=(row_spec, stat_spec, stat_spec),
        compiler_params=cparams,
    )(h, x2p, w2, b2, scale1, shift1, mask)

    scale2, shift2 = _bn_scale_shift(s2, q2, B, params["g2"], params["be2"], eps)

    # Stage 3: out = bn2(r), written in-place over r (same shape/dtype).
    out = pl.pallas_call(
        _affine_kernel,
        out_shape=jax.ShapeDtypeStruct((Bp, n_h), jnp.float32),
        grid=(nt,),
        in_specs=[row_spec, vec_spec, vec_spec],
        out_specs=row_spec,
        input_output_aliases={0: 0},
        compiler_params=cparams,
    )(r, scale2, shift2)

    return out[:B]


# ----------------------------------------------------------------------------
# Parameters (deterministic, synthetic)
# ----------------------------------------------------------------------------
def spectral_normalize(w, iters=30):
    # TODO(synk): PyTorch spectral_norm does one power iteration per forward with
    # a persistent random u; here sigma is approximated once at parameter setup
    # with a converged deterministic power iteration.
    u = jnp.full((w.shape[0],), 1.0 / jnp.sqrt(w.shape[0]), jnp.float32)
    v = None
    for _ in range(iters):
        v = w.T @ u
        v = v / (jnp.linalg.norm(v) + 1e-12)
        u = w @ v
        u = u / (jnp.linalg.norm(u) + 1e-12)
    sigma = u @ (w @ v)
    return w / sigma


def init_params(key, n_hidden):
    k0, k1, k2, k3 = jax.random.split(key, 4)
    lim = 1.0 / jnp.sqrt(n_hidden)
    # Weights stored (in, out) so the kernel computes x @ W (lane-dense over out).
    w1 = spectral_normalize(jax.random.uniform(k0, (n_hidden, n_hidden), jnp.float32, -lim, lim))
    b1 = jax.random.uniform(k1, (n_hidden,), jnp.float32, -lim, lim)
    w2 = spectral_normalize(jax.random.uniform(k2, (n_hidden, n_hidden), jnp.float32, -lim, lim))
    b2 = jax.random.uniform(k3, (n_hidden,), jnp.float32, -lim, lim)
    return dict(
        w1=w1.astype(jnp.bfloat16), b1=b1,
        g1=jnp.ones((n_hidden,), jnp.float32), be1=jnp.zeros((n_hidden,), jnp.float32),
        w2=w2.astype(jnp.bfloat16), b2=b2,
        g2=jnp.ones((n_hidden,), jnp.float32), be2=jnp.zeros((n_hidden,), jnp.float32),
    )


# ----------------------------------------------------------------------------
# Pure-JAX reference (f32) for a tolerance check
# ----------------------------------------------------------------------------
def resblock_fc_reference(x, params, eps=1e-5):
    n_h = params["b1"].shape[0]
    x2 = x.reshape(-1, n_h).astype(jnp.float32)
    w1 = params["w1"].astype(jnp.float32)
    w2 = params["w2"].astype(jnp.float32)
    h = jnp.maximum(x2 @ w1 + params["b1"], 0.0)
    m1 = h.mean(0)
    v1 = ((h - m1) ** 2).mean(0)
    hn = (h - m1) / jnp.sqrt(v1 + eps) * params["g1"] + params["be1"]
    r = jnp.maximum(hn @ w2 + params["b2"] + x2, 0.0)
    m2 = r.mean(0)
    v2 = ((r - m2) ** 2).mean(0)
    return (r - m2) / jnp.sqrt(v2 + eps) * params["g2"] + params["be2"]


# ----------------------------------------------------------------------------
if __name__ == "__main__":
    key = jax.random.PRNGKey(0)
    k_param, k_input = jax.random.split(key)

    n_hidden = 128
    params = init_params(k_param, n_hidden)
    # Input (2, 8, 128); forward flattens to (-1, n_hidden) like x.view(-1, n_h).
    x = jax.random.normal(k_input, (2, 8, n_hidden), jnp.float32)

    out = resblock_fc_forward(x, params)
    out = jax.block_until_ready(out)

    assert out.shape == (16, n_hidden), out.shape
    assert bool(jnp.all(jnp.isfinite(out)))

    ref = resblock_fc_reference(x, params)
    max_err = float(jnp.max(jnp.abs(out - ref)))
    # BN-normalized outputs are O(1); bf16 operand/activation storage gives
    # small absolute deviations from the f32 reference.
    assert max_err < 0.2, max_err

    print("KERNEL_OK")
</pallas_src>

<mosaic_0001>
module attributes {stable_mosaic.version = 11 : i64} {
  func.func @_bn1_fc2_res_relu_stats_kernel(%arg0: i32, %arg1: memref<16x128xbf16, #tpu.memory_space<vmem>>, %arg2: memref<16x128xf32, #tpu.memory_space<vmem>>, %arg3: memref<128x128xbf16, #tpu.memory_space<vmem>>, %arg4: memref<1x128xf32, #tpu.memory_space<vmem>>, %arg5: memref<1x128xf32, #tpu.memory_space<vmem>>, %arg6: memref<1x128xf32, #tpu.memory_space<vmem>>, %arg7: memref<16x1xf32, #tpu.memory_space<vmem>>, %arg8: memref<16x128xf32, #tpu.memory_space<vmem>>, %arg9: memref<1x1x128xf32, #tpu.memory_space<vmem>>, %arg10: memref<1x1x128xf32, #tpu.memory_space<vmem>>) attributes {dimension_semantics = [#tpu.dimension_semantics<parallel>], iteration_bounds = array<i64: 1>, scalar_prefetch = 0 : i64, scratch_operands = 0 : i64, tpu.core_type = #tpu.core_type<tc>, window_params = [{transform_indices = @transform_0, window_bounds = array<i64: 16, 128>}, {transform_indices = @transform_1, window_bounds = array<i64: 16, 128>}, {pipeline_mode = #tpu.pipeline_mode<synchronous>, transform_indices = @transform_2, window_bounds = array<i64: 128, 128>}, {pipeline_mode = #tpu.pipeline_mode<synchronous>, transform_indices = @transform_3, window_bounds = array<i64: 1, 128>}, {pipeline_mode = #tpu.pipeline_mode<synchronous>, transform_indices = @transform_4, window_bounds = array<i64: 1, 128>}, {pipeline_mode = #tpu.pipeline_mode<synchronous>, transform_indices = @transform_5, window_bounds = array<i64: 1, 128>}, {transform_indices = @transform_6, window_bounds = array<i64: 16, 1>}, {transform_indices = @transform_7, window_bounds = array<i64: 16, 128>}, {transform_indices = @transform_8, window_bounds = array<i64: 1, 1, 128>}, {transform_indices = @transform_9, window_bounds = array<i64: 1, 1, 128>}]} {
    %c0 = arith.constant 0 : index
    %c0_0 = arith.constant 0 : index
    %0 = vector.load %arg1[%c0, %c0_0] : memref<16x128xbf16, #tpu.memory_space<vmem>>, vector<16x128xbf16>
    %1 = arith.extf %0 : vector<16x128xbf16> to vector<16x128xf32>
    %c0_1 = arith.constant 0 : index
    %c0_2 = arith.constant 0 : index
    %2 = vector.load %arg5[%c0_1, %c0_2] : memref<1x128xf32, #tpu.memory_space<vmem>>, vector<1x128xf32>
    %3 = vector.broadcast %2 : vector<1x128xf32> to vector<16x128xf32>
    %4 = arith.mulf %1, %3 : vector<16x128xf32>
    %c0_3 = arith.constant 0 : index
    %c0_4 = arith.constant 0 : index
    %5 = vector.load %arg6[%c0_3, %c0_4] : memref<1x128xf32, #tpu.memory_space<vmem>>, vector<1x128xf32>
    %6 = vector.broadcast %5 : vector<1x128xf32> to vector<16x128xf32>
    %7 = arith.addf %4, %6 : vector<16x128xf32>
    %8 = arith.truncf %7 : vector<16x128xf32> to vector<16x128xbf16>
    %c0_5 = arith.constant 0 : index
    %c0_6 = arith.constant 0 : index
    %9 = vector.load %arg3[%c0_5, %c0_6] : memref<128x128xbf16, #tpu.memory_space<vmem>>, vector<128x128xbf16>
    %cst = arith.constant dense<0.000000e+00> : vector<16x128xf32>
    %10 = tpu.matmul %8, %9, %cst {dimension_numbers = #tpu.dot_dimension_numbers<[1], [0], [0], [1], [0, 0, 1, 1], [], []>} : vector<16x128xbf16>, vector<128x128xbf16>, vector<16x128xf32> -> vector<16x128xf32>
    %c0_7 = arith.constant 0 : index
    %c0_8 = arith.constant 0 : index
    %11 = vector.load %arg4[%c0_7, %c0_8] : memref<1x128xf32, #tpu.memory_space<vmem>>, vector<1x128xf32>
    %12 = vector.broadcast %11 : vector<1x128xf32> to vector<16x128xf32>
    %13 = arith.addf %10, %12 : vector<16x128xf32>
    %c0_9 = arith.constant 0 : index
    %c0_10 = arith.constant 0 : index
    %14 = vector.load %arg2[%c0_9, %c0_10] : memref<16x128xf32, #tpu.memory_space<vmem>>, vector<16x128xf32>
    %15 = arith.addf %13, %14 : vector<16x128xf32>
    %cst_11 = arith.constant 0.000000e+00 : f32
    %16 = vector.broadcast %cst_11 : f32 to vector<16x128xf32>
    %17 = arith.maximumf %15, %16 : vector<16x128xf32>
    %c0_12 = arith.constant 0 : index
    %c0_13 = arith.constant 0 : index
    %18 = vector.load %arg8[%c0_12, %c0_13] : memref<16x128xf32, #tpu.memory_space<vmem>>, vector<16x128xf32>
    tpu.vector_store %arg8[%c0_12, %c0_13], %17 {strides = array<i32>} : memref<16x128xf32, #tpu.memory_space<vmem>>, vector<16x128xf32>,
    %c0_14 = arith.constant 0 : index
    %c0_15 = arith.constant 0 : index
    %19 = vector.load %arg7[%c0_14, %c0_15] : memref<16x1xf32, #tpu.memory_space<vmem>>, vector<16x1xf32>
    %20 = vector.broadcast %19 : vector<16x1xf32> to vector<16x128xf32>
    %21 = arith.mulf %17, %20 : vector<16x128xf32>
    %cst_16 = arith.constant dense<0.000000e+00> : vector<128xf32>
    %22 = vector.multi_reduction <add>, %21, %cst_16 [0] : vector<16x128xf32> to vector<128xf32>
    %23 = vector.shape_cast %22 : vector<128xf32> to vector<1x128xf32>
    %c0_17 = arith.constant 0 : index
    %c0_18 = arith.constant 0 : index
    %c0_19 = arith.constant 0 : index
    %24 = vector.load %arg9[%c0_17, %c0_18, %c0_19] : memref<1x1x128xf32, #tpu.memory_space<vmem>>, vector<1x1x128xf32>
    %25 = vector.shape_cast %24 : vector<1x1x128xf32> to vector<1x128xf32>
    %26 = vector.shape_cast %23 : vector<1x128xf32> to vector<1x1x128xf32>
    tpu.vector_store %arg9[%c0_17, %c0_18, %c0_19], %26 {strides = array<i32>} : memref<1x1x128xf32, #tpu.memory_space<vmem>>, vector<1x1x128xf32>,
    %27 = arith.mulf %21, %21 : vector<16x128xf32>
    %cst_20 = arith.constant dense<0.000000e+00> : vector<128xf32>
    %28 = vector.multi_reduction <add>, %27, %cst_20 [0] : vector<16x128xf32> to vector<128xf32>
    %29 = vector.shape_cast %28 : vector<128xf32> to vector<1x128xf32>
    %c0_21 = arith.constant 0 : index
    %c0_22 = arith.constant 0 : index
    %c0_23 = arith.constant 0 : index
    %30 = vector.load %arg10[%c0_21, %c0_22, %c0_23] : memref<1x1x128xf32, #tpu.memory_space<vmem>>, vector<1x1x128xf32>
    %31 = vector.shape_cast %30 : vector<1x1x128xf32> to vector<1x128xf32>
    %32 = vector.shape_cast %29 : vector<1x128xf32> to vector<1x1x128xf32>
    tpu.vector_store %arg10[%c0_21, %c0_22, %c0_23], %32 {strides = array<i32>} : memref<1x1x128xf32, #tpu.memory_space<vmem>>, vector<1x1x128xf32>,
    return
  }
  func.func @transform_0(%arg0: i32) -> (i32, i32) {
    %c0_i32 = arith.constant 0 : i32
    %c0_i32_0 = arith.constant 0 : i32
    return %arg0, %c0_i32 : i32, i32
  }
  func.func @transform_1(%arg0: i32) -> (i32, i32) {
    %c0_i32 = arith.constant 0 : i32
    %c0_i32_0 = arith.constant 0 : i32
    return %arg0, %c0_i32 : i32, i32
  }
  func.func @transform_2(%arg0: i32) -> (i32, i32) {
    %c0_i32 = arith.constant 0 : i32
    %c0_i32_0 = arith.constant 0 : i32
    %c0_i32_1 = arith.constant 0 : i32
    return %c0_i32, %c0_i32_0 : i32, i32
  }
  func.func @transform_3(%arg0: i32) -> (i32, i32) {
    %c0_i32 = arith.constant 0 : i32
    %c0_i32_0 = arith.constant 0 : i32
    %c0_i32_1 = arith.constant 0 : i32
    return %c0_i32, %c0_i32_0 : i32, i32
  }
  func.func @transform_4(%arg0: i32) -> (i32, i32) {
    %c0_i32 = arith.constant 0 : i32
    %c0_i32_0 = arith.constant 0 : i32
    %c0_i32_1 = arith.constant 0 : i32
    return %c0_i32, %c0_i32_0 : i32, i32
  }
  func.func @transform_5(%arg0: i32) -> (i32, i32) {
    %c0_i32 = arith.constant 0 : i32
    %c0_i32_0 = arith.constant 0 : i32
    %c0_i32_1 = arith.constant 0 : i32
    return %c0_i32, %c0_i32_0 : i32, i32
  }
  func.func @transform_6(%arg0: i32) -> (i32, i32) {
    %c0_i32 = arith.constant 0 : i32
    %c0_i32_0 = arith.constant 0 : i32
    return %arg0, %c0_i32 : i32, i32
  }
  func.func @transform_7(%arg0: i32) -> (i32, i32) {
    %c0_i32 = arith.constant 0 : i32
    %c0_i32_0 = arith.constant 0 : i32
    return %arg0, %c0_i32 : i32, i32
  }
  func.func @transform_8(%arg0: i32) -> (i32, i32, i32) {
    %c0_i32 = arith.constant 0 : i32
    %c0_i32_0 = arith.constant 0 : i32
    %c0_i32_1 = arith.constant 0 : i32
    return %arg0, %c0_i32, %c0_i32_0 : i32, i32, i32
  }
  func.func @transform_9(%arg0: i32) -> (i32, i32, i32) {
    %c0_i32 = arith.constant 0 : i32
    %c0_i32_0 = arith.constant 0 : i32
    %c0_i32_1 = arith.constant 0 : i32
    return %arg0, %c0_i32, %c0_i32_0 : i32, i32, i32
  }
}

module attributes {stable_mosaic.version = 11 : i64} {
  func.func @_fc1_relu_stats_kernel(%arg0: i32, %arg1: memref<16x128xf32, #tpu.memory_space<vmem>>, %arg2: memref<128x128xbf16, #tpu.memory_space<vmem>>, %arg3: memref<1x128xf32, #tpu.memory_space<vmem>>, %arg4: memref<16x1xf32, #tpu.memory_space<vmem>>, %arg5: memref<16x128xbf16, #tpu.memory_space<vmem>>, %arg6: memref<1x1x128xf32, #tpu.memory_space<vmem>>, %arg7: memref<1x1x128xf32, #tpu.memory_space<vmem>>) attributes {dimension_semantics = [#tpu.dimension_semantics<parallel>], iteration_bounds = array<i64: 1>, scalar_prefetch = 0 : i64, scratch_operands = 0 : i64, tpu.core_type = #tpu.core_type<tc>, window_params = [{transform_indices = @transform_0, window_bounds = array<i64: 16, 128>}, {pipeline_mode = #tpu.pipeline_mode<synchronous>, transform_indices = @transform_1, window_bounds = array<i64: 128, 128>}, {pipeline_mode = #tpu.pipeline_mode<synchronous>, transform_indices = @transform_2, window_bounds = array<i64: 1, 128>}, {transform_indices = @transform_3, window_bounds = array<i64: 16, 1>}, {transform_indices = @transform_4, window_bounds = array<i64: 16, 128>}, {transform_indices = @transform_5, window_bounds = array<i64: 1, 1, 128>}, {transform_indices = @transform_6, window_bounds = array<i64: 1, 1, 128>}]} {
    %c0 = arith.constant 0 : index
    %c0_0 = arith.constant 0 : index
    %0 = vector.load %arg1[%c0, %c0_0] : memref<16x128xf32, #tpu.memory_space<vmem>>, vector<16x128xf32>
    %1 = arith.truncf %0 : vector<16x128xf32> to vector<16x128xbf16>
    %c0_1 = arith.constant 0 : index
    %c0_2 = arith.constant 0 : index
    %2 = vector.load %arg2[%c0_1, %c0_2] : memref<128x128xbf16, #tpu.memory_space<vmem>>, vector<128x128xbf16>
    %cst = arith.constant dense<0.000000e+00> : vector<16x128xf32>
    %3 = tpu.matmul %1, %2, %cst {dimension_numbers = #tpu.dot_dimension_numbers<[1], [0], [0], [1], [0, 0, 1, 1], [], []>} : vector<16x128xbf16>, vector<128x128xbf16>, vector<16x128xf32> -> vector<16x128xf32>
    %c0_3 = arith.constant 0 : index
    %c0_4 = arith.constant 0 : index
    %4 = vector.load %arg3[%c0_3, %c0_4] : memref<1x128xf32, #tpu.memory_space<vmem>>, vector<1x128xf32>
    %5 = vector.broadcast %4 : vector<1x128xf32> to vector<16x128xf32>
    %6 = arith.addf %3, %5 : vector<16x128xf32>
    %cst_5 = arith.constant 0.000000e+00 : f32
    %7 = vector.broadcast %cst_5 : f32 to vector<16x128xf32>
    %8 = arith.maximumf %6, %7 : vector<16x128xf32>
    %9 = arith.truncf %8 : vector<16x128xf32> to vector<16x128xbf16>
    %c0_6 = arith.constant 0 : index
    %c0_7 = arith.constant 0 : index
    %10 = vector.load %arg5[%c0_6, %c0_7] : memref<16x128xbf16, #tpu.memory_space<vmem>>, vector<16x128xbf16>
    tpu.vector_store %arg5[%c0_6, %c0_7], %9 {strides = array<i32>} : memref<16x128xbf16, #tpu.memory_space<vmem>>, vector<16x128xbf16>,
    %c0_8 = arith.constant 0 : index
    %c0_9 = arith.constant 0 : index
    %11 = vector.load %arg4[%c0_8, %c0_9] : memref<16x1xf32, #tpu.memory_space<vmem>>, vector<16x1xf32>
    %12 = vector.broadcast %11 : vector<16x1xf32> to vector<16x128xf32>
    %13 = arith.mulf %8, %12 : vector<16x128xf32>
    %cst_10 = arith.constant dense<0.000000e+00> : vector<128xf32>
    %14 = vector.multi_reduction <add>, %13, %cst_10 [0] : vector<16x128xf32> to vector<128xf32>
    %15 = vector.shape_cast %14 : vector<128xf32> to vector<1x128xf32>
    %c0_11 = arith.constant 0 : index
    %c0_12 = arith.constant 0 : index
    %c0_13 = arith.constant 0 : index
    %16 = vector.load %arg6[%c0_11, %c0_12, %c0_13] : memref<1x1x128xf32, #tpu.memory_space<vmem>>, vector<1x1x128xf32>
    %17 = vector.shape_cast %16 : vector<1x1x128xf32> to vector<1x128xf32>
    %18 = vector.shape_cast %15 : vector<1x128xf32> to vector<1x1x128xf32>
    tpu.vector_store %arg6[%c0_11, %c0_12, %c0_13], %18 {strides = array<i32>} : memref<1x1x128xf32, #tpu.memory_space<vmem>>, vector<1x1x128xf32>,
    %19 = arith.mulf %13, %13 : vector<16x128xf32>
    %cst_14 = arith.constant dense<0.000000e+00> : vector<128xf32>
    %20 = vector.multi_reduction <add>, %19, %cst_14 [0] : vector<16x128xf32> to vector<128xf32>
    %21 = vector.shape_cast %20 : vector<128xf32> to vector<1x128xf32>
    %c0_15 = arith.constant 0 : index
    %c0_16 = arith.constant 0 : index
    %c0_17 = arith.constant 0 : index
    %22 = vector.load %arg7[%c0_15, %c0_16, %c0_17] : memref<1x1x128xf32, #tpu.memory_space<vmem>>, vector<1x1x128xf32>
    %23 = vector.shape_cast %22 : vector<1x1x128xf32> to vector<1x128xf32>
    %24 = vector.shape_cast %21 : vector<1x128xf32> to vector<1x1x128xf32>
    tpu.vector_store %arg7[%c0_15, %c0_16, %c0_17], %24 {strides = array<i32>} : memref<1x1x128xf32, #tpu.memory_space<vmem>>, vector<1x1x128xf32>,
    return
  }
  func.func @transform_0(%arg0: i32) -> (i32, i32) {
    %c0_i32 = arith.constant 0 : i32
    %c0_i32_0 = arith.constant 0 : i32
    return %arg0, %c0_i32 : i32, i32
  }
  func.func @transform_1(%arg0: i32) -> (i32, i32) {
    %c0_i32 = arith.constant 0 : i32
    %c0_i32_0 = arith.constant 0 : i32
    %c0_i32_1 = arith.constant 0 : i32
    return %c0_i32, %c0_i32_0 : i32, i32
  }
  func.func @transform_2(%arg0: i32) -> (i32, i32) {
    %c0_i32 = arith.constant 0 : i32
    %c0_i32_0 = arith.constant 0 : i32
    %c0_i32_1 = arith.constant 0 : i32
    return %c0_i32, %c0_i32_0 : i32, i32
  }
  func.func @transform_3(%arg0: i32) -> (i32, i32) {
    %c0_i32 = arith.constant 0 : i32
    %c0_i32_0 = arith.constant 0 : i32
    return %arg0, %c0_i32 : i32, i32
  }
  func.func @transform_4(%arg0: i32) -> (i32, i32) {
    %c0_i32 = arith.constant 0 : i32
    %c0_i32_0 = arith.constant 0 : i32
    return %arg0, %c0_i32 : i32, i32
  }
  func.func @transform_5(%arg0: i32) -> (i32, i32, i32) {
    %c0_i32 = arith.constant 0 : i32
    %c0_i32_0 = arith.constant 0 : i32
    %c0_i32_1 = arith.constant 0 : i32
    return %arg0, %c0_i32, %c0_i32_0 : i32, i32, i32
  }
  func.func @transform_6(%arg0: i32) -> (i32, i32, i32) {
    %c0_i32 = arith.constant 0 : i32
    %c0_i32_0 = arith.constant 0 : i32
    %c0_i32_1 = arith.constant 0 : i32
    return %arg0, %c0_i32, %c0_i32_0 : i32, i32, i32
  }
}

module attributes {stable_mosaic.version = 11 : i64} {
  func.func @_affine_kernel(%arg0: i32, %arg1: memref<16x128xf32, #tpu.memory_space<vmem>>, %arg2: memref<1x128xf32, #tpu.memory_space<vmem>>, %arg3: memref<1x128xf32, #tpu.memory_space<vmem>>, %arg4: memref<16x128xf32, #tpu.memory_space<vmem>>) attributes {dimension_semantics = [#tpu.dimension_semantics<parallel>], iteration_bounds = array<i64: 1>, scalar_prefetch = 0 : i64, scratch_operands = 0 : i64, tpu.core_type = #tpu.core_type<tc>, window_params = [{transform_indices = @transform_0, window_bounds = array<i64: 16, 128>}, {pipeline_mode = #tpu.pipeline_mode<synchronous>, transform_indices = @transform_1, window_bounds = array<i64: 1, 128>}, {pipeline_mode = #tpu.pipeline_mode<synchronous>, transform_indices = @transform_2, window_bounds = array<i64: 1, 128>}, {transform_indices = @transform_3, window_bounds = array<i64: 16, 128>}]} {
    %c0 = arith.constant 0 : index
    %c0_0 = arith.constant 0 : index
    %0 = vector.load %arg1[%c0, %c0_0] : memref<16x128xf32, #tpu.memory_space<vmem>>, vector<16x128xf32>
    %c0_1 = arith.constant 0 : index
    %c0_2 = arith.constant 0 : index
    %1 = vector.load %arg2[%c0_1, %c0_2] : memref<1x128xf32, #tpu.memory_space<vmem>>, vector<1x128xf32>
    %2 = vector.broadcast %1 : vector<1x128xf32> to vector<16x128xf32>
    %3 = arith.mulf %0, %2 : vector<16x128xf32>
    %c0_3 = arith.constant 0 : index
    %c0_4 = arith.constant 0 : index
    %4 = vector.load %arg3[%c0_3, %c0_4] : memref<1x128xf32, #tpu.memory_space<vmem>>, vector<1x128xf32>
    %5 = vector.broadcast %4 : vector<1x128xf32> to vector<16x128xf32>
    %6 = arith.addf %3, %5 : vector<16x128xf32>
    %c0_5 = arith.constant 0 : index
    %c0_6 = arith.constant 0 : index
    %7 = vector.load %arg4[%c0_5, %c0_6] : memref<16x128xf32, #tpu.memory_space<vmem>>, vector<16x128xf32>
    tpu.vector_store %arg4[%c0_5, %c0_6], %6 {strides = array<i32>} : memref<16x128xf32, #tpu.memory_space<vmem>>, vector<16x128xf32>,
    return
  }
  func.func @transform_0(%arg0: i32) -> (i32, i32) {
    %c0_i32 = arith.constant 0 : i32
    %c0_i32_0 = arith.constant 0 : i32
    return %arg0, %c0_i32 : i32, i32
  }
  func.func @transform_1(%arg0: i32) -> (i32, i32) {
    %c0_i32 = arith.constant 0 : i32
    %c0_i32_0 = arith.constant 0 : i32
    %c0_i32_1 = arith.constant 0 : i32
    return %c0_i32, %c0_i32_0 : i32, i32
  }
  func.func @transform_2(%arg0: i32) -> (i32, i32) {
    %c0_i32 = arith.constant 0 : i32
    %c0_i32_0 = arith.constant 0 : i32
    %c0_i32_1 = arith.constant 0 : i32
    return %c0_i32, %c0_i32_0 : i32, i32
  }
  func.func @transform_3(%arg0: i32) -> (i32, i32) {
    %c0_i32 = arith.constant 0 : i32
    %c0_i32_0 = arith.constant 0 : i32
    return %arg0, %c0_i32 : i32, i32
  }
}

</mosaic_0001>

<bundles_post_ra>
// kernel: resblock_fc_forward.5
= control target key start
LH: loop header
LB: loop body
LE: loop exit
PB: predicated region body
PF: predicated region fallthrough
CT: control target
= control target key end

     0   :  { %8 = vsyncpa [#allocation3], 0  ;;  %s182_s0 = inlined_call_operand.hbm [shape: f32[16,128], index: 0, kind: input, shape index: {}, may-alias: {0,3}]   ;;  %s183_s1 = inlined_call_operand.vmem [shape: f32[1,128], index: 1, kind: input, shape index: {}]   ;;  %s184_s2 = inlined_call_operand.vmem [shape: f32[1,128], index: 2, kind: input, shape index: {}]   ;;  %s185_s3 = inlined_call_operand.hbm [shape: f32[16,128], index: 3, kind: output, shape index: {}, may-alias: {0,3}]  }
   0x1   :  { %9 = vsyncpa [#allocation4], 0  ;;  %s122_s12 = smov [#allocation2]   ;;  %s74_s16 = scalar_lea.hbm %s182_s0, 256 }
   0x2   :  { %s15_s13 = sshll.u32 %s122_s12, 4  ;;  %p75_p0 = scmp.ne.s32.totalorder %s182_s0, %s74_s16  ;;  %s16_s13 = int_to_ptr.vmem [resolvable:$true] %s15_s13 }
   0x3   :  { %p78_p1 = scmp.lt.u32.totalorder %s74_s16, %s182_s0 }
   0x5   :  { %p80_p2 = pnand %p78_p1, %p75_p0 }
   0x7   :  { %83 = shalt.err (!%p80_p2)
}
   0x8   :  { %s84_s21 = scalar_lea.vmem %s16_s13, 256  ;;  %p89_p4 = scmp.lt.s32.totalorder %s16_s13, %s16_s13 }
   0x9   :  { %p85_p3 = scmp.ne.s32.totalorder %s16_s13, %s84_s21  ;;  %p90_p5 = scmp.lt.s32.totalorder %s84_s21, %s84_s21 }
   0xb   :  { %p91_p6 = por %p90_p5, %p89_p4 }
   0xd   :  { %p92_p7 = pnand %p91_p6, %p85_p3 }
   0xf   :  { %95 = shalt.err (!%p92_p7)
}
  0x10   :  { %s123_s22 = smov 128   ;;  %s124_s23 = smov 8  }
  0x11   :  { %21 = dma.hbm_to_vmem [thread:$0]  %s182_s0, 256, %s16_s13, [#allocation3], %s123_s22, %s123_s22, %s124_s23  }
  0x12   :  { %118 = dma.done.wait [#allocation3], 256  }
  0x13   :  { %119 = vsyncadd [#allocation3], 4294967040  ;;  %v29_v0 = vld [vmem:[#allocation2] sm:$0xff]  ;;  %v30_v4 = vld [vmem:[#allocation2 + $0x8] sm:$0xff]  ;;  %s125_s30 = smov [#allocation5]  }
  0x14   :  { %v68_v1 = vld [vmem:[%s183_s1] ss:$0 sm:$0xff]  ;;  %s56_s4 = sshll.u32 %s125_s30, 4  ;;  %s57_s4 = int_to_ptr.vmem [resolvable:$true] %s56_s4 }
  0x15   :  { %v69_v2 = vld [vmem:[%s184_s2] ss:$0 sm:$0xff]  ;;  %v38_v3 = vmul.f32 %v68_v1, %v29_v0  ;;  %v39_v5 = vmul.f32 %v68_v1, %v30_v4  ;;  %s96_s0 = scalar_lea.vmem %s57_s4, 256  ;;  %p101_p9 = scmp.lt.s32.totalorder %s57_s4, %s57_s4 }
  0x16   :  { %p97_p8 = scmp.ne.s32.totalorder %s57_s4, %s96_s0  ;;  %p102_p10 = scmp.lt.s32.totalorder %s96_s0, %s96_s0 }
  0x17   :  { %v47_v6 = vadd.f32 %v69_v2, %v38_v3  ;;  %v48_v7 = vadd.f32 %v69_v2, %v39_v5 }
  0x18   :  { %p103_p11 = por %p102_p10, %p101_p9 }
  0x19   :  { %49 = vst [vmem:[#allocation5] sm:$0xff] %v47_v6  ;;  %50 = vst [vmem:[#allocation5 + $0x8] sm:$0xff] %v48_v7 }
  0x1a   :  { %p104_p12 = pnand %p103_p11, %p97_p8 }
  0x1c   :  { %107 = shalt.err (!%p104_p12)
}
  0x1d   :  { %s108_s2 = scalar_lea.hbm %s185_s3, 256 }
  0x1e   :  { %p109_p13 = scmp.ne.s32.totalorder %s185_s3, %s108_s2  ;;  %p112_p0 = scmp.lt.u32.totalorder %s108_s2, %s185_s3 }
  0x20   :  { %p114_p1 = pnand %p112_p0, %p109_p13 }
  0x22   :  { %117 = shalt.err (!%p114_p1)
}
  0x23   :  { %62 = dma.vmem_to_hbm [thread:$0]  %s57_s4, 256, %s185_s3, [#allocation4], %s123_s22, %s123_s22, %s124_s23  }
  0x24   :  { %120 = dma.done.wait [#allocation4], 256  }
  0x25   :  { %121 = vsyncadd [#allocation4], 4294967040 }
  0x26   :  { %66 = vsyncpa [#allocation3], 1 }
  0x27   :  { %67 = vsyncpa [#allocation4], 1 }

// kernel: resblock_fc_forward.4
= control target key start
LH: loop header
LB: loop body
LE: loop exit
PB: predicated region body
PF: predicated region fallthrough
CT: control target
= control target key end

     0   :  { %v313_v1 = vmov 0.0   ;;  %vm314_vm0 = vmmov 0   ;;  %v315_v3 = vmov 0   ;;  %s435_s0 = inlined_call_operand.vmem [shape: bf16[16,128], index: 0, kind: input, shape index: {}]   ;;  %s436_s1 = inlined_call_operand.vmem [shape: f32[16,128], index: 1, kind: input, shape index: {}]   ;;  %s437_s2 = inlined_call_operand.vmem [shape: bf16[128,128], index: 2, kind: input, shape index: {}]   ;;  %s438_s3 = inlined_call_operand.vmem [shape: f32[1,128], index: 3, kind: input, shape index: {}]   ;;  %s439_s4 = inlined_call_operand.vmem [shape: f32[1,128], index: 4, kind: input, shape index: {}]   ;;  %s440_s5 = inlined_call_operand.vmem [shape: f32[1,128], index: 5, kind: input, shape index: {}]   ;;  %s441_s6 = inlined_call_operand.vmem [shape: f32[16,1], index: 6, kind: input, shape index: {}]   ;;  %s442_s7 = inlined_call_operand.hbm [shape: f32[16,128], index: 7, kind: output, shape index: {0}]   ;;  %s443_s8 = inlined_call_operand.vmem [shape: f32[1,1,128], index: 8, kind: output, shape index: {1}]   ;;  %s444_s9 = inlined_call_operand.vmem [shape: f32[1,1,128], index: 9, kind: output, shape index: {2}]  }
   0x1   :  { %v281_v0 = vld [vmem:[%s437_s2] sm:$0xff]   ;;  %254 = vmatprep.subr.bf16.mxu0 %v313_v1  ;;  %v282_v2 = vld [vmem:[%s437_s2 + $0x8] sm:$0xff]   ;;  %270 = vmatprep.mubr.msk.bf16.mxu0 %vm314_vm0, %v313_v1  ;;  %v283_v4 = vld [vmem:[%s437_s2 + $0x10] sm:$0xff]  }
   0x2   :  { %255 = vmatpush3.bf16.msra.mxu0 %v281_v0  ;;  %280 = vset.pattern.permute.xlu0 %v315_v3  ;;  %v174_v5 = vld [vmem:[%s441_s6] sm:$0xff]  ;;  %v284_v6 = vld [vmem:[%s437_s2 + $0x18] sm:$0xff]  }
   0x3   :  { %256 = vmatprep.subr.bf16.mxu0 %v313_v1  ;;  %178 = vperm.xlu0 %280, %v174_v5  }
   0x6   :  { %257 = vmatpush3.bf16.msra.mxu0 %v282_v2 }
   0x7   :  { %258 = vmatprep.subr.bf16.mxu0 %v313_v1 }
   0xa   :  { %259 = vmatpush3.bf16.msra.mxu0 %v283_v4 }
   0xb   :  { %15 = vsyncpa [#allocation3], 0  ;;  %260 = vmatprep.subr.bf16.mxu0 %v313_v1  ;;  %v175_v7 = vld [vmem:[%s441_s6 + $0x8] sm:$0xff]  ;;  %v285_v8 = vld [vmem:[%s437_s2 + $0x20] sm:$0xff]  }
   0xc   :  { %v242_v9 = vld [vmem:[%s435_s0] sm:$0xff]   ;;  %183 = vperm.xlu0 %280, %v175_v7   ;;  %v286_v12 = vld [vmem:[%s437_s2 + $0x28] sm:$0xff]   ;;  %v287_v16 = vld [vmem:[%s437_s2 + $0x30] sm:$0xff]  }
   0xd   :  { %v243_v10 = vunpack.c.l.bf16 %v242_v9  ;;  %v244_v11 = vunpack.c.h.bf16 %v242_v9  ;;  %v230_v13 = vld [vmem:[%s439_s4] ss:$0 sm:$0xff]  ;;  %v288_v20 = vld [vmem:[%s437_s2 + $0x38] sm:$0xff]   ;;  %v167_v29 = vld [vmem:[%s436_s1 + $0x8] sm:$0xff]  ;;  %s316_s2 = smov [#allocation2]  }
   0xe   :  { %261 = vmatpush3.bf16.msra.mxu0 %v284_v6  ;;  %v231_v17 = vld [vmem:[%s440_s5] ss:$0 sm:$0xff]  ;;  %s211_s16 = sshll.u32 %s316_s2, 4  ;;  %s212_s16 = int_to_ptr.vmem [resolvable:$true] %s211_s16 }
   0xf   :  { %262 = vmatprep.subr.bf16.mxu0 %v313_v1  ;;  %v42_v14 = vmul.f32 %v243_v10, %v230_v13  ;;  %v43_v15 = vmul.f32 %v244_v11, %v230_v13  ;;  %v232_v22 = vld [vmem:[%s438_s3] ss:$0 sm:$0xff]  ;;  %s289_s3 = scalar_lea.vmem %s212_s16, 256  ;;  %p294_p1 = scmp.lt.s32.totalorder %s212_s16, %s212_s16 }
  0x10   :  { %v166_v24 = vld [vmem:[%s436_s1] sm:$0xff]  ;;  %p290_p0 = scmp.ne.s32.totalorder %s212_s16, %s289_s3  ;;  %p295_p2 = scmp.lt.s32.totalorder %s289_s3, %s289_s3 }
  0x11   :  { %v51_v18 = vadd.f32 %v231_v17, %v42_v14  ;;  %v52_v19 = vadd.f32 %v231_v17, %v43_v15 }
  0x12   :  { %263 = vmatpush3.bf16.msra.mxu0 %v285_v8  ;;  %p296_p3 = por %p295_p2, %p294_p1 }
  0x13   :  { %264 = vmatprep.subr.bf16.mxu0 %v313_v1  ;;  %v53_v21 = vpack.c.bf16 %v52_v19, %v51_v18 }
  0x14   :  { %p297_p4 = pnand %p296_p3, %p290_p0 }
  0x16   :  { %265 = vmatpush3.bf16.msra.mxu0 %v286_v12 }
  0x17   :  { %266 = vmatprep.subr.bf16.mxu0 %v313_v1 }
  0x1a   :  { %267 = vmatpush3.bf16.msra.mxu0 %v287_v16 }
  0x1b   :  { %268 = vmatprep.subr.bf16.mxu0 %v313_v1 }
  0x1e   :  { %269 = vmatpush3.bf16.msra.mxu0 %v288_v20 }
  0x21   :  { %271 = vmatmul.mubr.bf16.vlgmr.msra.gmra.mrb[0].mxu0 %v53_v21 }
  0x82   :  { %v179_v27 = vpop.permute.xlu0 %178 }
  0x8b   :  { %v184_v37 = vpop.permute.xlu0 %183 }
  0xf4   :  { %v159_v23 = vpop.f32.mrb[0].mxu0 }
  0xf5   :  { %v160_v25 = vadd.f32 %v232_v22, %v159_v23  ;;  %v272_v26 = vpop.f32.mrb[1].mxu0 }
  0xf6   :  { %v162_v28 = vpop.f32.mrb[2].mxu0 }
  0xf7   :  { %v168_v30 = vadd.f32 %v166_v24, %v160_v25  ;;  %v163_v31 = vadd.f32 %v232_v22, %v162_v28  ;;  %v273_v32 = vpop.f32.mrb[3].mxu0 }
  0xf9   :  { %v170_v33 = vmax.f32 %v168_v30, 0.0  ;;  %v169_v34 = vadd.f32 %v167_v29, %v163_v31 }
  0xfb   :  { %172 = vst [vmem:[#allocation2] sm:$0xff] %v170_v33  ;;  %v171_v35 = vmax.f32 %v169_v34, 0.0  ;;  %v186_v36 = vmul.f32 %v179_v27, %v170_v33 }
  0xfd   :  { %173 = vst [vmem:[#allocation2 + $0x8] sm:$0xff] %v171_v35  ;;  %v187_v38 = vmul.f32 %v184_v37, %v171_v35 }
  0xfe   :  { %300 = shalt.err (!%p297_p4)
}
  0xff   :  { %s301_s18 = scalar_lea.hbm %s442_s7, 256 }
 0x100   :  { %p302_p5 = scmp.ne.s32.totalorder %s442_s7, %s301_s18  ;;  %p305_p6 = scmp.lt.u32.totalorder %s301_s18, %s442_s7 }
 0x102   :  { %p307_p7 = pnand %p305_p6, %p302_p5 }
 0x104   :  { %310 = shalt.err (!%p307_p7)
}
 0x105   :  { %s317_s23 = smov 128   ;;  %s318_s24 = smov 8   ;;  %v188_v39 = vadd.f32 %v187_v38, %v186_v36  ;;  %v196_v40 = vmul.f32 %v186_v36, %v186_v36  ;;  %v197_v41 = vmul.f32 %v187_v38, %v187_v38 }
 0x106   :  { %217 = dma.vmem_to_hbm [thread:$0]  %s212_s16, 256, %s442_s7, [#allocation3], %s317_s23, %s317_s23, %s318_s24  }
 0x107   :  { %v189_v42 = vrot.slane %v188_v39, 4  ;;  %v198_v43 = vadd.f32 %v197_v41, %v196_v40 }
 0x109   :  { %v190_v44 = vadd.f32 %v189_v42, %v188_v39  ;;  %v199_v45 = vrot.slane %v198_v43, 4 }
 0x10b   :  { %v191_v46 = vrot.slane %v190_v44, 2  ;;  %v200_v47 = vadd.f32 %v199_v45, %v198_v43 }
 0x10d   :  { %v192_v48 = vadd.f32 %v191_v46, %v190_v44  ;;  %v201_v49 = vrot.slane %v200_v47, 2 }
 0x10f   :  { %v193_v50 = vrot.slane %v192_v48, 1  ;;  %v202_v51 = vadd.f32 %v201_v49, %v200_v47 }
 0x111   :  { %v194_v52 = vadd.f32 %v193_v50, %v192_v48  ;;  %v203_v53 = vrot.slane %v202_v51, 1 }
 0x113   :  { %195 = vst [vmem:[%s443_s8] sm:$0x1] %v194_v52  ;;  %v204_v54 = vadd.f32 %v203_v53, %v202_v51 }
 0x115   :  { %205 = vst [vmem:[%s444_s9] sm:$0x1] %v204_v54 }
 0x116   :  { %311 = dma.done.wait [#allocation3], 256  }
 0x117   :  { %312 = vsyncadd [#allocation3], 4294967040 }
 0x118   :  { %229 = vsyncpa [#allocation3], 1 }

// kernel: resblock_fc_forward.3
= control target key start
LH: loop header
LB: loop body
LE: loop exit
PB: predicated region body
PF: predicated region fallthrough
CT: control target
= control target key end

     0   :  { %12 = vsyncpa [#allocation3], 0  ;;  %s293_s21 = smov [#allocation2]   ;;  %s370_s0 = inlined_call_operand.vmem [shape: f32[16,128], index: 0, kind: input, shape index: {}]   ;;  %s371_s1 = inlined_call_operand.hbm [shape: bf16[128,128], index: 1, kind: input, shape index: {}]   ;;  %s372_s2 = inlined_call_operand.vmem [shape: f32[1,128], index: 2, kind: input, shape index: {}]   ;;  %s373_s3 = inlined_call_operand.vmem [shape: f32[16,1], index: 3, kind: input, shape index: {}]   ;;  %s374_s4 = inlined_call_operand.vmem [shape: bf16[16,128], index: 4, kind: output, shape index: {0}]   ;;  %s375_s5 = inlined_call_operand.vmem [shape: f32[1,1,128], index: 5, kind: output, shape index: {1}]   ;;  %s376_s6 = inlined_call_operand.vmem [shape: f32[1,1,128], index: 6, kind: output, shape index: {2}]  }
   0x1   :  { %s20_s22 = sshll.u32 %s293_s21, 4  ;;  %s269_s25 = scalar_lea.hbm %s371_s1, 1024  ;;  %s21_s22 = int_to_ptr.vmem [resolvable:$true] %s20_s22 }
   0x2   :  { %p270_p0 = scmp.ne.s32.totalorder %s371_s1, %s269_s25  ;;  %p273_p1 = scmp.lt.u32.totalorder %s269_s25, %s371_s1 }
   0x4   :  { %p275_p2 = pnand %p273_p1, %p270_p0 }
   0x6   :  { %278 = shalt.err (!%p275_p2)
}
   0x7   :  { %s279_s30 = scalar_lea.vmem %s21_s22, 1024  ;;  %p284_p4 = scmp.lt.s32.totalorder %s21_s22, %s21_s22 }
   0x8   :  { %p280_p3 = scmp.ne.s32.totalorder %s21_s22, %s279_s30  ;;  %p285_p5 = scmp.lt.s32.totalorder %s279_s30, %s279_s30 }
   0xa   :  { %p286_p6 = por %p285_p5, %p284_p4 }
   0xc   :  { %p287_p7 = pnand %p286_p6, %p280_p3 }
   0xe   :  { %290 = shalt.err (!%p287_p7)
}
   0xf   :  { %s294_s7 = smov 64   ;;  %s295_s8 = smov 4  }
  0x10   :  { %26 = dma.hbm_to_vmem [thread:$0]  %s371_s1, 1024, %s21_s22, [#allocation3], %s294_s7, %s294_s7, %s295_s8  }
  0x11   :  { %291 = dma.done.wait [#allocation3], 1024  }
  0x12   :  { %292 = vsyncadd [#allocation3], 4294966272  ;;  %v296_v0 = vmov 0.0   ;;  %vm297_vm0 = vmmov 0   ;;  %v298_v1 = vmov 0   ;;  %v261_v2 = vld [vmem:[#allocation2] sm:$0xff]  }
  0x13   :  { %234 = vmatprep.subr.bf16.mxu0 %v296_v0  ;;  %250 = vmatprep.mubr.msk.bf16.mxu0 %vm297_vm0, %v296_v0  ;;  %v262_v3 = vld [vmem:[#allocation2 + $0x8] sm:$0xff]   ;;  %v263_v4 = vld [vmem:[#allocation2 + $0x10] sm:$0xff]   ;;  %v162_v5 = vld [vmem:[%s373_s3] sm:$0xff] }
  0x14   :  { %260 = vset.pattern.permute.xlu0 %v298_v1  ;;  %235 = vmatpush3.bf16.msra.mxu0 %v261_v2  ;;  %v264_v6 = vld [vmem:[#allocation2 + $0x18] sm:$0xff]   ;;  %v163_v7 = vld [vmem:[%s373_s3 + $0x8] sm:$0xff]  ;;  %v265_v8 = vld [vmem:[#allocation2 + $0x20] sm:$0xff]  }
  0x15   :  { %236 = vmatprep.subr.bf16.mxu0 %v296_v0  ;;  %166 = vperm.xlu0 %260, %v162_v5   ;;  %v266_v9 = vld [vmem:[#allocation2 + $0x28] sm:$0xff]   ;;  %v267_v10 = vld [vmem:[#allocation2 + $0x30] sm:$0xff]   ;;  %v268_v11 = vld [vmem:[#allocation2 + $0x38] sm:$0xff]  }
  0x16   :  { %v35_v12 = vld [vmem:[%s370_s0] sm:$0xff]  ;;  %v36_v13 = vld [vmem:[%s370_s0 + $0x8] sm:$0xff] }
  0x17   :  { %v37_v14 = vpack.c.bf16 %v36_v13, %v35_v12  ;;  %v207_v15 = vld [vmem:[%s372_s2] ss:$0 sm:$0xff] }
  0x18   :  { %237 = vmatpush3.bf16.msra.mxu0 %v262_v3 }
  0x19   :  { %238 = vmatprep.subr.bf16.mxu0 %v296_v0  ;;  %171 = vperm.xlu0 %260, %v163_v7  }
  0x1c   :  { %239 = vmatpush3.bf16.msra.mxu0 %v263_v4 }
  0x1d   :  { %240 = vmatprep.subr.bf16.mxu0 %v296_v0 }
  0x20   :  { %241 = vmatpush3.bf16.msra.mxu0 %v264_v6 }
  0x21   :  { %242 = vmatprep.subr.bf16.mxu0 %v296_v0 }
  0x24   :  { %243 = vmatpush3.bf16.msra.mxu0 %v265_v8 }
  0x25   :  { %244 = vmatprep.subr.bf16.mxu0 %v296_v0 }
  0x28   :  { %245 = vmatpush3.bf16.msra.mxu0 %v266_v9 }
  0x29   :  { %246 = vmatprep.subr.bf16.mxu0 %v296_v0 }
  0x2c   :  { %247 = vmatpush3.bf16.msra.mxu0 %v267_v10 }
  0x2d   :  { %248 = vmatprep.subr.bf16.mxu0 %v296_v0 }
  0x30   :  { %249 = vmatpush3.bf16.msra.mxu0 %v268_v11 }
  0x33   :  { %251 = vmatmul.mubr.bf16.vlgmr.msra.gmra.mrb[0].mxu0 %v37_v14 }
  0x94   :  { %v167_v16 = vpop.permute.xlu0 %166 }
  0x98   :  { %v172_v26 = vpop.permute.xlu0 %171 }
 0x106   :  { %v143_v17 = vpop.f32.mrb[0].mxu0 }
 0x107   :  { %v144_v18 = vadd.f32 %v207_v15, %v143_v17  ;;  %v252_v19 = vpop.f32.mrb[1].mxu0 }
 0x108   :  { %v146_v20 = vpop.f32.mrb[2].mxu0 }
 0x109   :  { %v150_v21 = vmax.f32 %v144_v18, 0.0  ;;  %v147_v22 = vadd.f32 %v207_v15, %v146_v20  ;;  %v253_v23 = vpop.f32.mrb[3].mxu0 }
 0x10b   :  { %v174_v24 = vmul.f32 %v167_v16, %v150_v21  ;;  %v151_v25 = vmax.f32 %v147_v22, 0.0 }
 0x10d   :  { %v223_v27 = vpack.c.bf16 %v151_v25, %v150_v21  ;;  %v175_v28 = vmul.f32 %v172_v26, %v151_v25  ;;  %v184_v29 = vmul.f32 %v174_v24, %v174_v24 }
 0x10f   :  { %224 = vst [vmem:[%s374_s4] sm:$0xff] %v223_v27   ;;  %v176_v30 = vadd.f32 %v175_v28, %v174_v24  ;;  %v185_v31 = vmul.f32 %v175_v28, %v175_v28 }
 0x111   :  { %v177_v32 = vrot.slane %v176_v30, 4  ;;  %v186_v33 = vadd.f32 %v185_v31, %v184_v29 }
 0x113   :  { %v178_v34 = vadd.f32 %v177_v32, %v176_v30  ;;  %v187_v35 = vrot.slane %v186_v33, 4 }
 0x115   :  { %v179_v36 = vrot.slane %v178_v34, 2  ;;  %v188_v37 = vadd.f32 %v187_v35, %v186_v33 }
 0x117   :  { %v180_v38 = vadd.f32 %v179_v36, %v178_v34  ;;  %v189_v39 = vrot.slane %v188_v37, 2 }
 0x119   :  { %v181_v40 = vrot.slane %v180_v38, 1  ;;  %v190_v41 = vadd.f32 %v189_v39, %v188_v37 }
 0x11b   :  { %v182_v42 = vadd.f32 %v181_v40, %v180_v38  ;;  %v191_v43 = vrot.slane %v190_v41, 1 }
 0x11d   :  { %183 = vst [vmem:[%s375_s5] sm:$0x1] %v182_v42  ;;  %v192_v44 = vadd.f32 %v191_v43, %v190_v41 }
 0x11f   :  { %193 = vst [vmem:[%s376_s6] sm:$0x1] %v192_v44 }
 0x120   :  { %206 = vsyncpa [#allocation3], 1 }

</bundles_post_ra>
